<compile_context>
chip_gen: v5e
topology: v5e:2x2
jax: 0.10.0
libtpu: 0.0.40
codegen_flags: <defaults>
</compile_context>

<pallas_src>
import math

import jax
import jax.numpy as jnp
from jax.experimental import pallas as pl
from jax.experimental.pallas import tpu as pltpu


# ----------------------------------------------------------------------------
# Pallas kernel: out = relu(x @ w1 + b1) @ w2 + b2, fully fused in VMEM.
# ----------------------------------------------------------------------------
def _mlp_fused_kernel(x_ref, w1_ref, b1_ref, w2_ref, b2_ref, o_ref):
    # fc1: bf16 MXU matmul with f32 accumulation; bias + ReLU in f32.
    h = jnp.dot(x_ref[...], w1_ref[...], preferred_element_type=jnp.float32)
    h = jnp.maximum(h + b1_ref[...], 0.0)
    # fc2: second MXU matmul on the VMEM-resident hidden activation.
    o = jnp.dot(h.astype(w2_ref.dtype), w2_ref[...],
                preferred_element_type=jnp.float32)
    o_ref[...] = (o + b2_ref[...]).astype(o_ref.dtype)


# ----------------------------------------------------------------------------
# Helpers
# ----------------------------------------------------------------------------
def _round_up(x, m):
    return ((x + m - 1) // m) * m


def _pick_tm(n_rows):
    """Row-tile choice: 8-aligned, <=512, and >=2 blocks for mid-size batches
    so v7x's two TensorCores both get a share of the 'parallel' M axis."""
    n8 = _round_up(max(n_rows, 1), 8)
    if n8 <= 256:
        return n8                              # tiny batch: one block
    if n8 <= 1024:
        return _round_up(pl.cdiv(n8, 2), 8)    # two row blocks
    return 512


def prepare_params(params, *, lane_pad=128):
    """One-time prep (hoisted off the hot path): cast weights to bf16, pad the
    fc2 output features up to a lane-dense multiple of 128 with zero columns,
    and reshape biases to (1, features)."""
    w1, b1 = params["fc1"]
    w2, b2 = params["fc2"]
    H = w1.shape[1]
    C = w2.shape[1]
    Cp = _round_up(C, lane_pad)
    w2_p = jnp.pad(w2, ((0, 0), (0, Cp - C)))
    b2_p = jnp.pad(b2, (0, Cp - C))
    return (
        w1.astype(jnp.bfloat16),
        b1.reshape(1, H).astype(jnp.float32),
        w2_p.astype(jnp.bfloat16),
        b2_p.reshape(1, Cp).astype(jnp.float32),
    )


# ----------------------------------------------------------------------------
# Wrapper: flatten -> fused fc1/relu/fc2 kernel -> slice real logits.
# ----------------------------------------------------------------------------
def mlp_forward(x, prepared, *, num_classes=10, tm=None):
    w1, b1, w2, b2 = prepared
    N = x.shape[0]
    x2 = x.reshape(N, -1).astype(jnp.bfloat16)      # nn.Flatten + bf16 for MXU
    K, H = w1.shape                                  # 784, 256
    Cp = w2.shape[1]                                 # 128 (lane-dense)

    if tm is None:
        tm = _pick_tm(N)
    grid_m = pl.cdiv(N, tm)

    flops = 2 * N * (K * H + H * Cp)
    bytes_accessed = (N * K * 2 + K * H * 2 + H * Cp * 2
                      + (H + Cp) * 4 + N * Cp * 4)

    out = pl.pallas_call(
        _mlp_fused_kernel,
        out_shape=jax.ShapeDtypeStruct((N, Cp), jnp.float32),
        grid_spec=pltpu.PrefetchScalarGridSpec(
            num_scalar_prefetch=0,
            grid=(grid_m,),
            in_specs=[
                pl.BlockSpec((tm, K), lambda i: (i, 0)),   # x rows (streamed)
                pl.BlockSpec((K, H), lambda i: (0, 0)),    # w1 (resident)
                pl.BlockSpec((1, H), lambda i: (0, 0)),    # b1
                pl.BlockSpec((H, Cp), lambda i: (0, 0)),   # w2 (resident)
                pl.BlockSpec((1, Cp), lambda i: (0, 0)),   # b2
            ],
            out_specs=pl.BlockSpec((tm, Cp), lambda i: (i, 0)),
        ),
        compiler_params=pltpu.CompilerParams(
            dimension_semantics=("parallel",),
        ),
        cost_estimate=pl.CostEstimate(
            flops=flops, transcendentals=0, bytes_accessed=bytes_accessed),
    )(x2, w1, b1, w2, b2)

    # Padded columns are exact zeros (zero weight/bias columns); slice off.
    return out[:, :num_classes]


# ----------------------------------------------------------------------------
# Parameter init (PyTorch nn.Linear-style uniform(-1/sqrt(fan_in), +...))
# ----------------------------------------------------------------------------
def init_mlp_params(key):
    k1, k2, k3, k4 = jax.random.split(key, 4)
    fin1, fout1 = 28 * 28, 256
    fin2, fout2 = 256, 10
    bd1 = 1.0 / math.sqrt(fin1)
    bd2 = 1.0 / math.sqrt(fin2)
    # stored as (in, out) == torch weight.T, used as x @ w + b
    w1 = jax.random.uniform(k1, (fin1, fout1), jnp.float32, -bd1, bd1)
    b1 = jax.random.uniform(k2, (fout1,), jnp.float32, -bd1, bd1)
    w2 = jax.random.uniform(k3, (fin2, fout2), jnp.float32, -bd2, bd2)
    b2 = jax.random.uniform(k4, (fout2,), jnp.float32, -bd2, bd2)
    return {"fc1": (w1, b1), "fc2": (w2, b2)}


if __name__ == "__main__":
    key = jax.random.PRNGKey(0)
    k_param, k_input = jax.random.split(key)

    params = init_mlp_params(k_param)
    prepared = prepare_params(params)           # one-time, off the hot path

    # MNIST-like input implied by fc1 = Linear(28*28, 256): (N, 1, 28, 28).
    x = jax.random.normal(k_input, (2, 1, 28, 28), jnp.float32)

    fwd = jax.jit(mlp_forward)
    out = jax.block_until_ready(fwd(x, prepared))

    # Pure-JAX f32 reference sanity check (bf16 inputs => relaxed tolerance).
    xr = x.reshape(x.shape[0], -1)
    w1, b1 = params["fc1"]
    w2, b2 = params["fc2"]
    ref = jnp.maximum(xr @ w1 + b1, 0.0) @ w2 + b2

    assert out.shape == (2, 10), out.shape
    assert out.dtype == jnp.float32
    max_err = float(jnp.max(jnp.abs(out - ref)))
    assert max_err < 5e-2, f"max abs error vs reference: {max_err}"
    print("KERNEL_OK")
</pallas_src>

<mosaic_0001>
module attributes {stable_mosaic.version = 11 : i64} {
  func.func @_mlp_fused_kernel(%arg0: i32, %arg1: memref<8x784xbf16, #tpu.memory_space<vmem>>, %arg2: memref<784x256xbf16, #tpu.memory_space<vmem>>, %arg3: memref<1x256xf32, #tpu.memory_space<vmem>>, %arg4: memref<256x128xbf16, #tpu.memory_space<vmem>>, %arg5: memref<1x128xf32, #tpu.memory_space<vmem>>, %arg6: memref<8x128xf32, #tpu.memory_space<vmem>>) attributes {dimension_semantics = [#tpu.dimension_semantics<parallel>], iteration_bounds = array<i64: 1>, scalar_prefetch = 0 : i64, scratch_operands = 0 : i64, tpu.core_type = #tpu.core_type<tc>, window_params = [{transform_indices = @transform_0, window_bounds = array<i64: 8, 784>}, {pipeline_mode = #tpu.pipeline_mode<synchronous>, transform_indices = @transform_1, window_bounds = array<i64: 784, 256>}, {pipeline_mode = #tpu.pipeline_mode<synchronous>, transform_indices = @transform_2, window_bounds = array<i64: 1, 256>}, {pipeline_mode = #tpu.pipeline_mode<synchronous>, transform_indices = @transform_3, window_bounds = array<i64: 256, 128>}, {pipeline_mode = #tpu.pipeline_mode<synchronous>, transform_indices = @transform_4, window_bounds = array<i64: 1, 128>}, {transform_indices = @transform_5, window_bounds = array<i64: 8, 128>}]} {
    %c0 = arith.constant 0 : index
    %c0_0 = arith.constant 0 : index
    %0 = vector.load %arg1[%c0, %c0_0] : memref<8x784xbf16, #tpu.memory_space<vmem>>, vector<8x784xbf16>
    %c0_1 = arith.constant 0 : index
    %c0_2 = arith.constant 0 : index
    %1 = vector.load %arg2[%c0_1, %c0_2] : memref<784x256xbf16, #tpu.memory_space<vmem>>, vector<784x256xbf16>
    %cst = arith.constant dense<0.000000e+00> : vector<8x256xf32>
    %2 = tpu.matmul %0, %1, %cst {dimension_numbers = #tpu.dot_dimension_numbers<[1], [0], [0], [1], [0, 0, 1, 1], [], []>} : vector<8x784xbf16>, vector<784x256xbf16>, vector<8x256xf32> -> vector<8x256xf32>
    %c0_3 = arith.constant 0 : index
    %c0_4 = arith.constant 0 : index
    %3 = vector.load %arg3[%c0_3, %c0_4] : memref<1x256xf32, #tpu.memory_space<vmem>>, vector<1x256xf32>
    %4 = vector.broadcast %3 : vector<1x256xf32> to vector<8x256xf32>
    %5 = arith.addf %2, %4 : vector<8x256xf32>
    %cst_5 = arith.constant 0.000000e+00 : f32
    %6 = vector.broadcast %cst_5 : f32 to vector<8x256xf32>
    %7 = arith.maximumf %5, %6 : vector<8x256xf32>
    %8 = arith.truncf %7 : vector<8x256xf32> to vector<8x256xbf16>
    %c0_6 = arith.constant 0 : index
    %c0_7 = arith.constant 0 : index
    %9 = vector.load %arg4[%c0_6, %c0_7] : memref<256x128xbf16, #tpu.memory_space<vmem>>, vector<256x128xbf16>
    %cst_8 = arith.constant dense<0.000000e+00> : vector<8x128xf32>
    %10 = tpu.matmul %8, %9, %cst_8 {dimension_numbers = #tpu.dot_dimension_numbers<[1], [0], [0], [1], [0, 0, 1, 1], [], []>} : vector<8x256xbf16>, vector<256x128xbf16>, vector<8x128xf32> -> vector<8x128xf32>
    %c0_9 = arith.constant 0 : index
    %c0_10 = arith.constant 0 : index
    %11 = vector.load %arg5[%c0_9, %c0_10] : memref<1x128xf32, #tpu.memory_space<vmem>>, vector<1x128xf32>
    %12 = vector.broadcast %11 : vector<1x128xf32> to vector<8x128xf32>
    %13 = arith.addf %10, %12 : vector<8x128xf32>
    %c0_11 = arith.constant 0 : index
    %c0_12 = arith.constant 0 : index
    %14 = vector.load %arg6[%c0_11, %c0_12] : memref<8x128xf32, #tpu.memory_space<vmem>>, vector<8x128xf32>
    tpu.vector_store %arg6[%c0_11, %c0_12], %13 {strides = array<i32>} : memref<8x128xf32, #tpu.memory_space<vmem>>, vector<8x128xf32>,
    return
  }
  func.func @transform_0(%arg0: i32) -> (i32, i32) {
    %c0_i32 = arith.constant 0 : i32
    %c0_i32_0 = arith.constant 0 : i32
    return %arg0, %c0_i32 : i32, i32
  }
  func.func @transform_1(%arg0: i32) -> (i32, i32) {
    %c0_i32 = arith.constant 0 : i32
    %c0_i32_0 = arith.constant 0 : i32
    %c0_i32_1 = arith.constant 0 : i32
    return %c0_i32, %c0_i32_0 : i32, i32
  }
  func.func @transform_2(%arg0: i32) -> (i32, i32) {
    %c0_i32 = arith.constant 0 : i32
    %c0_i32_0 = arith.constant 0 : i32
    %c0_i32_1 = arith.constant 0 : i32
    return %c0_i32, %c0_i32_0 : i32, i32
  }
  func.func @transform_3(%arg0: i32) -> (i32, i32) {
    %c0_i32 = arith.constant 0 : i32
    %c0_i32_0 = arith.constant 0 : i32
    %c0_i32_1 = arith.constant 0 : i32
    return %c0_i32, %c0_i32_0 : i32, i32
  }
  func.func @transform_4(%arg0: i32) -> (i32, i32) {
    %c0_i32 = arith.constant 0 : i32
    %c0_i32_0 = arith.constant 0 : i32
    %c0_i32_1 = arith.constant 0 : i32
    return %c0_i32, %c0_i32_0 : i32, i32
  }
  func.func @transform_5(%arg0: i32) -> (i32, i32) {
    %c0_i32 = arith.constant 0 : i32
    %c0_i32_0 = arith.constant 0 : i32
    return %arg0, %c0_i32 : i32, i32
  }
}

</mosaic_0001>

<bundles_post_ra>
// kernel: mlp_forward.1
= control target key start
LH: loop header
LB: loop body
LE: loop exit
PB: predicated region body
PF: predicated region fallthrough
CT: control target
= control target key end

     0   :  { %10 = vsyncpa [#allocation3], 0  ;;  %s1839_s0 = inlined_call_operand.vmem [shape: bf16[2,784], index: 0, kind: input, shape index: {}]   ;;  %s1840_s1 = inlined_call_operand.hbm [shape: bf16[784,256], index: 1, kind: input, shape index: {}]   ;;  %s1841_s2 = inlined_call_operand.hbm [shape: f32[1,256], index: 2, kind: input, shape index: {}]   ;;  %s1842_s3 = inlined_call_operand.vmem [shape: bf16[256,128], index: 3, kind: input, shape index: {}]   ;;  %s1843_s4 = inlined_call_operand.vmem [shape: f32[1,128], index: 4, kind: input, shape index: {}]   ;;  %s1844_s5 = inlined_call_operand.hbm [shape: f32[2,128], index: 5, kind: output, shape index: {}]  }
   0x1   :  { %11 = vsyncpa [#allocation6], 0 }
   0x2   :  { %12 = vsyncpa [#allocation4], 0  ;;  %s19_s20 = sshll.u32 %s1840_s1, 4  ;;  %s1700_s21 = smov [#allocation2]   ;;  %s20_s20 = int_to_ptr.hbm [resolvable:$true] %s19_s20 }
   0x3   :  { %s21_s22 = sshll.u32 %s1700_s21, 4  ;;  %s33_s25 = sshll.u32 %s1841_s2, 4  ;;  %s22_s22 = int_to_ptr.vmem [resolvable:$true] %s21_s22  ;;  %s34_s25 = int_to_ptr.hbm [resolvable:$true] %s33_s25 }
   0x4   :  { %s1701_s26 = smov 128   ;;  %s1702_s27 = smov 8  }
   0x5   :  { %27 = dma.hbm_to_vmem [thread:$0]  %s20_s20, 12544, %s22_s22, [#allocation3], %s1701_s26, %s1701_s26, %s1702_s27  }
   0x6   :  { %s1703_s28 = smov [#allocation5]  }
   0x7   :  { %s35_s29 = sshll.u32 %s1703_s28, 4  ;;  %s36_s29 = int_to_ptr.vmem [resolvable:$true] %s35_s29 }
   0x8   :  { %38 = dma.hbm_to_vmem [thread:$0]  %s34_s25, 32, %s36_s29, [#allocation6]  }
   0x9   :  { %1694 = dma.done.wait [#allocation3], 12544  }
   0xa   :  { %1695 = vsyncadd [#allocation3], 4294954752 }
   0xb   :  { %1696 = dma.done.wait [#allocation6], 32  }
   0xc   :  { %1697 = vsyncadd [#allocation6], 4294967264  ;;  %v1100_v0 = vld [vmem:[#allocation2 + $0x70] sm:$0xf]  ;;  %v1515_v1 = vld [vmem:[#allocation2 + $0x74] sm:$0xf0] }
   0xd   :  { %v1228_v2 = vld [vmem:[#allocation2 + $0x170] sm:$0xf]  ;;  %v1101_v3 = vor.u32 %v1515_v1, %v1100_v0  ;;  %v1547_v4 = vld [vmem:[#allocation2 + $0x174] sm:$0xf0]  ;;  %v1092_v11 = vld [vmem:[#allocation2 + $0x60] sm:$0xf] }
   0xe   :  { %v1292_v5 = vld [vmem:[#allocation2 + $0x1f0] sm:$0xf]  ;;  %v1563_v6 = vld [vmem:[#allocation2 + $0x1f4] sm:$0xf0]  ;;  %v1229_v7 = vor.u32 %v1547_v4, %v1228_v2  ;;  %v1513_v13 = vld [vmem:[#allocation2 + $0x64] sm:$0xf0] }
   0xf   :  { %v1293_v8 = vor.u32 %v1563_v6, %v1292_v5  ;;  %v1164_v9 = vld [vmem:[#allocation2 + $0xf0] sm:$0xf]  ;;  %v1531_v10 = vld [vmem:[#allocation2 + $0xf4] sm:$0xf0]  ;;  %677 = vmatpush.bf16.msra.mxu0 %v1101_v3  ;;  %v1220_v14 = vld [vmem:[#allocation2 + $0x160] sm:$0xf]  ;;  %v1093_v16 = vor.u32 %v1513_v13, %v1092_v11 }
  0x10   :  { %v1165_v12 = vor.u32 %v1531_v10, %v1164_v9  ;;  %v1545_v15 = vld [vmem:[#allocation2 + $0x164] sm:$0xf0]  ;;  %703 = vmatpush.bf16.msra.mxu2 %v1229_v7  ;;  %v1284_v18 = vld [vmem:[#allocation2 + $0x1e0] sm:$0xf]  ;;  %v1084_v23 = vld [vmem:[#allocation2 + $0x50] sm:$0xf] }
  0x11   :  { %716 = vmatpush.bf16.msra.mxu3 %v1293_v8  ;;  %v1221_v17 = vor.u32 %v1545_v15, %v1220_v14  ;;  %v1561_v19 = vld [vmem:[#allocation2 + $0x1e4] sm:$0xf0]  ;;  %v1156_v20 = vld [vmem:[#allocation2 + $0xe0] sm:$0xf]  ;;  %v1511_v24 = vld [vmem:[#allocation2 + $0x54] sm:$0xf0] }
  0x12   :  { %690 = vmatpush.bf16.msra.mxu1 %v1165_v12  ;;  %v1285_v21 = vor.u32 %v1561_v19, %v1284_v18  ;;  %v1529_v22 = vld [vmem:[#allocation2 + $0xe4] sm:$0xf0]  ;;  %v1212_v26 = vld [vmem:[#allocation2 + $0x150] sm:$0xf]  ;;  %v1543_v27 = vld [vmem:[#allocation2 + $0x154] sm:$0xf0]  ;;  %v1085_v29 = vor.u32 %v1511_v24, %v1084_v23 }
  0x13   :  { %v1157_v25 = vor.u32 %v1529_v22, %v1156_v20  ;;  %v1276_v28 = vld [vmem:[#allocation2 + $0x1d0] sm:$0xf]  ;;  %678 = vmatpush.bf16.msra.mxu0 %v1093_v16  ;;  %v1559_v30 = vld [vmem:[#allocation2 + $0x1d4] sm:$0xf0]  ;;  %v1213_v33 = vor.u32 %v1543_v27, %v1212_v26  ;;  %v1076_v35 = vld [vmem:[#allocation2 + $0x40] sm:$0xf] }
  0x14   :  { %v1148_v31 = vld [vmem:[#allocation2 + $0xd0] sm:$0xf]  ;;  %v1527_v32 = vld [vmem:[#allocation2 + $0xd4] sm:$0xf0]  ;;  %704 = vmatpush.bf16.msra.mxu2 %v1221_v17  ;;  %v1277_v34 = vor.u32 %v1559_v30, %v1276_v28  ;;  %v1509_v36 = vld [vmem:[#allocation2 + $0x44] sm:$0xf0] }
  0x15   :  { %717 = vmatpush.bf16.msra.mxu3 %v1285_v21  ;;  %v1204_v37 = vld [vmem:[#allocation2 + $0x140] sm:$0xf]  ;;  %v1149_v38 = vor.u32 %v1527_v32, %v1148_v31  ;;  %v1541_v39 = vld [vmem:[#allocation2 + $0x144] sm:$0xf0]  ;;  %v1077_v44 = vor.u32 %v1509_v36, %v1076_v35  ;;  %v1068_v47 = vld [vmem:[#allocation2 + $0x30] sm:$0xf] }
  0x16   :  { %691 = vmatpush.bf16.msra.mxu1 %v1157_v25  ;;  %v1268_v40 = vld [vmem:[#allocation2 + $0x1c0] sm:$0xf]  ;;  %v1557_v41 = vld [vmem:[#allocation2 + $0x1c4] sm:$0xf0]  ;;  %v1205_v45 = vor.u32 %v1541_v39, %v1204_v37  ;;  %v1507_v48 = vld [vmem:[#allocation2 + $0x34] sm:$0xf0] }
  0x17   :  { %v1140_v42 = vld [vmem:[#allocation2 + $0xc0] sm:$0xf]  ;;  %v1525_v43 = vld [vmem:[#allocation2 + $0xc4] sm:$0xf0]  ;;  %679 = vmatpush.bf16.msra.mxu0 %v1085_v29  ;;  %v1269_v46 = vor.u32 %v1557_v41, %v1268_v40  ;;  %v1196_v49 = vld [vmem:[#allocation2 + $0x130] sm:$0xf]  ;;  %v1069_v56 = vor.u32 %v1507_v48, %v1068_v47 }
  0x18   :  { %705 = vmatpush.bf16.msra.mxu2 %v1213_v33  ;;  %v1141_v50 = vor.u32 %v1525_v43, %v1140_v42  ;;  %v1539_v51 = vld [vmem:[#allocation2 + $0x134] sm:$0xf0]  ;;  %v1260_v52 = vld [vmem:[#allocation2 + $0x1b0] sm:$0xf]  ;;  %v1060_v59 = vld [vmem:[#allocation2 + $0x20] sm:$0xf] }
  0x19   :  { %718 = vmatpush.bf16.msra.mxu3 %v1277_v34  ;;  %v1555_v53 = vld [vmem:[#allocation2 + $0x1b4] sm:$0xf0]  ;;  %v1132_v54 = vld [vmem:[#allocation2 + $0xb0] sm:$0xf]  ;;  %v1197_v57 = vor.u32 %v1539_v51, %v1196_v49  ;;  %v1505_v60 = vld [vmem:[#allocation2 + $0x24] sm:$0xf0] }
  0x1a   :  { %692 = vmatpush.bf16.msra.mxu1 %v1149_v38  ;;  %v1523_v55 = vld [vmem:[#allocation2 + $0xb4] sm:$0xf0]  ;;  %v1261_v58 = vor.u32 %v1555_v53, %v1260_v52  ;;  %v1188_v61 = vld [vmem:[#allocation2 + $0x120] sm:$0xf]  ;;  %v1537_v63 = vld [vmem:[#allocation2 + $0x124] sm:$0xf0]  ;;  %v1061_v4 = vor.u32 %v1505_v60, %v1060_v59 }
  0x1b   :  { %680 = vmatpush.bf16.msra.mxu0 %v1077_v44  ;;  %v1133_v62 = vor.u32 %v1523_v55, %v1132_v54  ;;  %v1252_v0 = vld [vmem:[#allocation2 + $0x1a0] sm:$0xf]  ;;  %v1553_v1 = vld [vmem:[#allocation2 + $0x1a4] sm:$0xf0]  ;;  %v1052_v5 = vld [vmem:[#allocation2 + $0x10] sm:$0xf]  ;;  %v1189_v7 = vor.u32 %v1537_v63, %v1188_v61 }
  0x1c   :  { %706 = vmatpush.bf16.msra.mxu2 %v1205_v45  ;;  %v1124_v2 = vld [vmem:[#allocation2 + $0xa0] sm:$0xf]  ;;  %v1521_v3 = vld [vmem:[#allocation2 + $0xa4] sm:$0xf0]  ;;  %v1503_v6 = vld [vmem:[#allocation2 + $0x14] sm:$0xf0]  ;;  %v1253_v8 = vor.u32 %v1553_v1, %v1252_v0 }
  0x1d   :  { %719 = vmatpush.bf16.msra.mxu3 %v1269_v46  ;;  %v1180_v9 = vld [vmem:[#allocation2 + $0x110] sm:$0xf]  ;;  %v1535_v10 = vld [vmem:[#allocation2 + $0x114] sm:$0xf0]  ;;  %v1125_v12 = vor.u32 %v1521_v3, %v1124_v2  ;;  %v1044_v16 = vld [vmem:[#allocation2] sm:$0xf]  ;;  %v1053_v19 = vor.u32 %v1503_v6, %v1052_v5 }
  0x1e   :  { %693 = vmatpush.bf16.msra.mxu1 %v1141_v50  ;;  %v1244_v11 = vld [vmem:[#allocation2 + $0x190] sm:$0xf]  ;;  %v1551_v13 = vld [vmem:[#allocation2 + $0x194] sm:$0xf0]  ;;  %v1501_v17 = vld [vmem:[#allocation2 + $0x4] sm:$0xf0]  ;;  %v1181_v26 = vor.u32 %v1535_v10, %v1180_v9 }
  0x1f   :  { %681 = vmatpush.bf16.msra.mxu0 %v1069_v56  ;;  %v1116_v14 = vld [vmem:[#allocation2 + $0x90] sm:$0xf]  ;;  %v1519_v15 = vld [vmem:[#allocation2 + $0x94] sm:$0xf0]  ;;  %v1172_v20 = vld [vmem:[#allocation2 + $0x100] sm:$0xf]  ;;  %v1245_v27 = vor.u32 %v1551_v13, %v1244_v11  ;;  %v1045_v36 = vor.u32 %v1501_v17, %v1044_v16 }
  0x20   :  { %707 = vmatpush.bf16.msra.mxu2 %v1197_v57  ;;  %v52_v18 = vld [vmem:[%s1839_s0] sm:$0x7f]  ;;  %v1533_v21 = vld [vmem:[#allocation2 + $0x104] sm:$0xf0]  ;;  %v1236_v22 = vld [vmem:[#allocation2 + $0x180] sm:$0xf]  ;;  %v1117_v31 = vor.u32 %v1519_v15, %v1116_v14 }
  0x21   :  { %720 = vmatpush.bf16.msra.mxu3 %v1261_v58  ;;  %v1549_v23 = vld [vmem:[#allocation2 + $0x184] sm:$0xf0]  ;;  %v53_v24 = vld [vmem:[%s1839_s0 + $0x7] sm:$0x7f]  ;;  %v1356_v28 = vld [vmem:[#allocation2 + $0x270] sm:$0xf]  ;;  %v1173_v39 = vor.u32 %v1533_v21, %v1172_v20 }
  0x22   :  { %694 = vmatpush.bf16.msra.mxu1 %v1133_v62  ;;  %v54_v25 = vld [vmem:[%s1839_s0 + $0xe] sm:$0x7f]  ;;  %v1579_v29 = vld [vmem:[#allocation2 + $0x274] sm:$0xf0]  ;;  %v55_v30 = vld [vmem:[%s1839_s0 + $0x15] sm:$0x7f]  ;;  %v1237_v40 = vor.u32 %v1549_v23, %v1236_v22 }
  0x23   :  { %682 = vmatpush.bf16.msra.mxu0 %v1061_v4  ;;  %161 = vst [vmem:[#allocation1] ss:$9 sm:$0xff] %v52_v18  ;;  %v1514_v32 = vld [vmem:[#allocation2 + $0x74] sm:$0xf]  ;;  %v1102_v33 = vld [vmem:[#allocation2 + $0x78] sm:$0xf0]  ;;  %v1357_v43 = vor.u32 %v1579_v29, %v1356_v28 }
  0x24   :  { %708 = vmatpush.bf16.msra.mxu2 %v1189_v7  ;;  %164 = vst [vmem:[#allocation1 + $0x1] ss:$9 sm:$0xff] %v53_v24  ;;  %v1108_v34 = vld [vmem:[#allocation2 + $0x80] sm:$0xf]  ;;  %v1517_v35 = vld [vmem:[#allocation2 + $0x84] sm:$0xf0]  ;;  %v1105_v44 = vor.u32 %v1514_v32, %v1102_v33 }
  0x25   :  { %721 = vmatpush.bf16.msra.mxu3 %v1253_v8  ;;  %167 = vst [vmem:[#allocation1 + $0x2] ss:$9 sm:$0xff] %v54_v25  ;;  %v1428_v37 = vld [vmem:[#allocation2 + $0x300] sm:$0xf]  ;;  %v1597_v38 = vld [vmem:[#allocation2 + $0x304] sm:$0xf0]  ;;  %v1109_v48 = vor.u32 %v1517_v35, %v1108_v34 }
  0x26   :  { %695 = vmatpush.bf16.msra.mxu1 %v1125_v12  ;;  %170 = vst [vmem:[#allocation1 + $0x3] ss:$9 sm:$0xff] %v55_v30  ;;  %v1420_v41 = vld [vmem:[#allocation2 + $0x2f0] sm:$0xf]  ;;  %v1595_v42 = vld [vmem:[#allocation2 + $0x2f4] sm:$0xf0]  ;;  %v1429_v49 = vor.u32 %v1597_v38, %v1428_v37 }
  0x27   :  { %683 = vmatpush.bf16.msra.mxu0 %v1053_v19  ;;  %v1530_v45 = vld [vmem:[#allocation2 + $0xf4] sm:$0xf]  ;;  %v1166_v46 = vld [vmem:[#allocation2 + $0xf8] sm:$0xf0]  ;;  %v1348_v47 = vld [vmem:[#allocation2 + $0x260] sm:$0xf]  ;;  %v1421_v53 = vor.u32 %v1595_v42, %v1420_v41 }
  0x28   :  { %709 = vmatpush.bf16.msra.mxu2 %v1181_v26  ;;  %v1577_v50 = vld [vmem:[#allocation2 + $0x264] sm:$0xf0]  ;;  %v1512_v51 = vld [vmem:[#allocation2 + $0x64] sm:$0xf]  ;;  %v1094_v52 = vld [vmem:[#allocation2 + $0x68] sm:$0xf0]  ;;  %v1169_v55 = vor.u32 %v1530_v45, %v1166_v46 }
  0x29   :  { %722 = vmatpush.bf16.msra.mxu3 %v1245_v27  ;;  %v1412_v54 = vld [vmem:[#allocation2 + $0x2e0] sm:$0xf]  ;;  %v1593_v56 = vld [vmem:[#allocation2 + $0x2e4] sm:$0xf0]  ;;  %v1528_v57 = vld [vmem:[#allocation2 + $0xe4] sm:$0xf]  ;;  %v1349_v59 = vor.u32 %v1577_v50, %v1348_v47  ;;  %v1097_v60 = vor.u32 %v1512_v51, %v1094_v52 }
  0x2a   :  { %696 = vmatpush.bf16.msra.mxu1 %v1117_v31  ;;  %v1158_v58 = vld [vmem:[#allocation2 + $0xe8] sm:$0xf0]  ;;  %v1340_v61 = vld [vmem:[#allocation2 + $0x250] sm:$0xf]  ;;  %v1575_v62 = vld [vmem:[#allocation2 + $0x254] sm:$0xf0]  ;;  %v1413_v3 = vor.u32 %v1593_v56, %v1412_v54 }
  0x2b   :  { %684 = vmatpush.bf16.msra.mxu0 %v1045_v36  ;;  %v1510_v63 = vld [vmem:[#allocation2 + $0x54] sm:$0xf]  ;;  %v1086_v1 = vld [vmem:[#allocation2 + $0x58] sm:$0xf0]  ;;  %v1161_v6 = vor.u32 %v1528_v57, %v1158_v58  ;;  %v1404_v7 = vld [vmem:[#allocation2 + $0x2d0] sm:$0xf]  ;;  %v1341_v9 = vor.u32 %v1575_v62, %v1340_v61 }
  0x2c   :  { %710 = vmatpush.bf16.msra.mxu2 %v1173_v39  ;;  %v1591_v8 = vld [vmem:[#allocation2 + $0x2d4] sm:$0xf0]  ;;  %v1089_v10 = vor.u32 %v1510_v63, %v1086_v1  ;;  %v1526_v11 = vld [vmem:[#allocation2 + $0xd4] sm:$0xf]  ;;  %v1150_v12 = vld [vmem:[#allocation2 + $0xd8] sm:$0xf0] }
  0x2d   :  { %723 = vmatpush.bf16.msra.mxu3 %v1237_v40  ;;  %v1755_v0 = vld [vmem:[#allocation1 + $0x12] sm:$0xff]  ;;  %v1757_v2 = vld [vmem:[#allocation1] sm:$0xff]  ;;  %v1762_v5 = vld [vmem:[#allocation1 + $0x9] sm:$0xff]  ;;  %v1405_v17 = vor.u32 %v1591_v8, %v1404_v7  ;;  %v1153_v18 = vor.u32 %v1526_v11, %v1150_v12  ;;  %vm674_vm0 = vcmask 130048  }
  0x2e   :  { %697 = vmatpush.bf16.msra.mxu1 %v1109_v48  ;;  %v1760_v4 = vld [vmem:[#allocation1 + $0x1b] sm:$0xff]  ;;  %685 = vmatmul.bf16.vlgmr.msra.gmra.mxu0 %v1757_v2  ;;  %v1332_v13 = vld [vmem:[#allocation2 + $0x240] sm:$0xf]  ;;  %v1573_v14 = vld [vmem:[#allocation2 + $0x244] sm:$0xf0] }
  0x2f   :  { %729 = vmatpush.bf16.msrb.mxu0 %v1357_v43  ;;  %711 = vmatmul.bf16.vlgmr.msra.gmra.mxu2 %v1755_v0  ;;  %v1508_v15 = vld [vmem:[#allocation2 + $0x44] sm:$0xf]  ;;  %v1078_v16 = vld [vmem:[#allocation2 + $0x48] sm:$0xf0]  ;;  %v1396_v19 = vld [vmem:[#allocation2 + $0x2c0] sm:$0xf]  ;;  %v1333_v21 = vor.u32 %v1573_v14, %v1332_v13 }
  0x30   :  { %762 = vmatpush.bf16.msrb.mxu2 %v1429_v49  ;;  %724 = vmatmul.bf16.vlgmr.msra.gmra.mxu3 %v1760_v4  ;;  %v1589_v20 = vld [vmem:[#allocation2 + $0x2c4] sm:$0xf0]  ;;  %v1081_v22 = vor.u32 %v1508_v15, %v1078_v16  ;;  %v1524_v23 = vld [vmem:[#allocation2 + $0xc4] sm:$0xf]  ;;  %v1142_v24 = vld [vmem:[#allocation2 + $0xc8] sm:$0xf0] }
  0x31   :  { %768 = vmatpush.bf16.msrb.mxu3 %v1105_v44  ;;  %698 = vmatmul.bf16.vlgmr.msra.gmra.mxu1 %v1762_v5  ;;  %v1324_v25 = vld [vmem:[#allocation2 + $0x230] sm:$0xf]  ;;  %v1571_v26 = vld [vmem:[#allocation2 + $0x234] sm:$0xf0]  ;;  %v1506_v27 = vld [vmem:[#allocation2 + $0x34] sm:$0xf]  ;;  %v1397_v29 = vor.u32 %v1589_v20, %v1396_v19  ;;  %v1145_v30 = vor.u32 %v1524_v23, %v1142_v24 }
  0x32   :  { %742 = vmatpush.bf16.msrb.mxu1 %v1421_v53  ;;  %v1070_v28 = vld [vmem:[#allocation2 + $0x38] sm:$0xf0]  ;;  %v1388_v31 = vld [vmem:[#allocation2 + $0x2b0] sm:$0xf]  ;;  %v1587_v32 = vld [vmem:[#allocation2 + $0x2b4] sm:$0xf0]  ;;  %v1325_v33 = vor.u32 %v1571_v26, %v1324_v25 }
  0x33   :  { %730 = vmatpush.bf16.msrb.mxu0 %v1349_v59  ;;  %v1073_v34 = vor.u32 %v1506_v27, %v1070_v28  ;;  %v1522_v35 = vld [vmem:[#allocation2 + $0xb4] sm:$0xf]  ;;  %v1134_v36 = vld [vmem:[#allocation2 + $0xb8] sm:$0xf0]  ;;  %v1316_v37 = vld [vmem:[#allocation2 + $0x220] sm:$0xf]  ;;  %v1389_v41 = vor.u32 %v1587_v32, %v1388_v31 }
  0x34   :  { %781 = vmatpush.bf16.msra.mxu2 %v1169_v55  ;;  %v1569_v38 = vld [vmem:[#allocation2 + $0x224] sm:$0xf0]  ;;  %v1504_v39 = vld [vmem:[#allocation2 + $0x24] sm:$0xf]  ;;  %v1062_v40 = vld [vmem:[#allocation2 + $0x28] sm:$0xf0]  ;;  %v1137_v42 = vor.u32 %v1522_v35, %v1134_v36 }
  0x35   :  { %769 = vmatpush.bf16.msrb.mxu3 %v1097_v60  ;;  %v1380_v43 = vld [vmem:[#allocation2 + $0x2a0] sm:$0xf]  ;;  %v1585_v44 = vld [vmem:[#allocation2 + $0x2a4] sm:$0xf0]  ;;  %v1767_v45 = vld [vmem:[#allocation1 + $0x36] sm:$0xff]  ;;  %v1317_v46 = vor.u32 %v1569_v38, %v1316_v37  ;;  %v1065_v47 = vor.u32 %v1504_v39, %v1062_v40 }
  0x36   :  { %743 = vmatpush.bf16.msrb.mxu1 %v1413_v3  ;;  %v1520_v48 = vld [vmem:[#allocation2 + $0xa4] sm:$0xf]  ;;  %v1126_v49 = vld [vmem:[#allocation2 + $0xa8] sm:$0xf0]  ;;  %v1308_v50 = vld [vmem:[#allocation2 + $0x210] sm:$0xf]  ;;  %v1381_v54 = vor.u32 %v1585_v44, %v1380_v43 }
  0x37   :  { %731 = vmatpush.bf16.msrb.mxu0 %v1341_v9  ;;  %v1567_v51 = vld [vmem:[#allocation2 + $0x214] sm:$0xf0]  ;;  %v1502_v52 = vld [vmem:[#allocation2 + $0x14] sm:$0xf]  ;;  %v1054_v53 = vld [vmem:[#allocation2 + $0x18] sm:$0xf0]  ;;  %v1129_v55 = vor.u32 %v1520_v48, %v1126_v49 }
  0x38   :  { %782 = vmatpush.bf16.msra.mxu2 %v1161_v6  ;;  %v1372_v56 = vld [vmem:[#allocation2 + $0x290] sm:$0xf]  ;;  %v1583_v57 = vld [vmem:[#allocation2 + $0x294] sm:$0xf0]  ;;  %v1518_v58 = vld [vmem:[#allocation2 + $0x94] sm:$0xf]  ;;  %v1309_v59 = vor.u32 %v1567_v51, %v1308_v50  ;;  %v1057_v60 = vor.u32 %v1502_v52, %v1054_v53 }
  0x39   :  { %770 = vmatpush.bf16.msrb.mxu3 %v1089_v10  ;;  %v1118_v61 = vld [vmem:[#allocation2 + $0x98] sm:$0xf0]  ;;  %v1300_v62 = vld [vmem:[#allocation2 + $0x200] sm:$0xf]  ;;  %v1565_v63 = vld [vmem:[#allocation2 + $0x204] sm:$0xf0]  ;;  %v1373_v7 = vor.u32 %v1583_v57, %v1372_v56 }
  0x3a   :  { %744 = vmatpush.bf16.msrb.mxu1 %v1405_v17  ;;  %v1500_v1 = vld [vmem:[#allocation2 + $0x4] sm:$0xf]  ;;  %v1046_v3 = vld [vmem:[#allocation2 + $0x8] sm:$0xf0]  ;;  %v1546_v6 = vld [vmem:[#allocation2 + $0x174] sm:$0xf]  ;;  %v1121_v11 = vor.u32 %v1518_v58, %v1118_v61  ;;  %v1301_v14 = vor.u32 %v1565_v63, %v1300_v62 }
  0x3b   :  { %732 = vmatpush.bf16.msrb.mxu0 %v1333_v21  ;;  %v1230_v8 = vld [vmem:[#allocation2 + $0x178] sm:$0xf0]  ;;  %v1578_v9 = vld [vmem:[#allocation2 + $0x274] sm:$0xf]  ;;  %v1364_v12 = vld [vmem:[#allocation2 + $0x280] sm:$0xf]  ;;  %v1049_v15 = vor.u32 %v1500_v1, %v1046_v3 }
  0x3c   :  { %783 = vmatpush.bf16.msra.mxu2 %v1153_v18  ;;  %v1358_v10 = vld [vmem:[#allocation2 + $0x278] sm:$0xf0]  ;;  %v1581_v13 = vld [vmem:[#allocation2 + $0x284] sm:$0xf0]  ;;  %v1516_v16 = vld [vmem:[#allocation2 + $0x84] sm:$0xf]  ;;  %v1233_v19 = vor.u32 %v1546_v6, %v1230_v8 }
  0x3d   :  { %771 = vmatpush.bf16.msrb.mxu3 %v1081_v22  ;;  %v1110_v17 = vld [vmem:[#allocation2 + $0x88] sm:$0xf0]  ;;  %v1562_v18 = vld [vmem:[#allocation2 + $0x1f4] sm:$0xf]  ;;  %v1361_v20 = vor.u32 %v1578_v9, %v1358_v10  ;;  %v1294_v21 = vld [vmem:[#allocation2 + $0x1f8] sm:$0xf0]  ;;  %v1365_v24 = vor.u32 %v1581_v13, %v1364_v12 }
  0x3e   :  { %745 = vmatpush.bf16.msrb.mxu1 %v1397_v29  ;;  %v1594_v22 = vld [vmem:[#allocation2 + $0x2f4] sm:$0xf]  ;;  %v1422_v23 = vld [vmem:[#allocation2 + $0x2f8] sm:$0xf0]  ;;  %v1544_v25 = vld [vmem:[#allocation2 + $0x164] sm:$0xf]  ;;  %v1113_v27 = vor.u32 %v1516_v16, %v1110_v17  ;;  %v1297_v31 = vor.u32 %v1562_v18, %v1294_v21 }
  0x3f   :  { %733 = vmatpush.bf16.msrb.mxu0 %v1325_v33  ;;  %1434 = vmatmul.msk.bf16.vlgmr.msrb.gmra.mxu2 %vm674_vm0, %v1767_v45  ;;  %v1222_v26 = vld [vmem:[#allocation2 + $0x168] sm:$0xf0]  ;;  %v1576_v28 = vld [vmem:[#allocation2 + $0x264] sm:$0xf]  ;;  %v1425_v32 = vor.u32 %v1594_v22, %v1422_v23  ;;  %v1542_v40 = vld [vmem:[#allocation2 + $0x154] sm:$0xf] }
  0x40   :  { %784 = vmatpush.bf16.msra.mxu2 %v1145_v30  ;;  %v1350_v29 = vld [vmem:[#allocation2 + $0x268] sm:$0xf0]  ;;  %v1771_v30 = vld [vmem:[#allocation1 + $0x24] sm:$0xff]  ;;  %v1560_v33 = vld [vmem:[#allocation2 + $0x1e4] sm:$0xf] }
  0x41   :  { %772 = vmatpush.bf16.msrb.mxu3 %v1073_v34  ;;  %v1225_v34 = vor.u32 %v1544_v25, %v1222_v26  ;;  %v1286_v35 = vld [vmem:[#allocation2 + $0x1e8] sm:$0xf0]  ;;  %v1592_v36 = vld [vmem:[#allocation2 + $0x2e4] sm:$0xf]  ;;  %v1353_v39 = vor.u32 %v1576_v28, %v1350_v29  ;;  %v1342_v43 = vld [vmem:[#allocation2 + $0x258] sm:$0xf0] }
  0x42   :  { %746 = vmatpush.bf16.msrb.mxu1 %v1389_v41  ;;  %v1414_v37 = vld [vmem:[#allocation2 + $0x2e8] sm:$0xf0]  ;;  %v1214_v41 = vld [vmem:[#allocation2 + $0x158] sm:$0xf0]  ;;  %v1289_v44 = vor.u32 %v1560_v33, %v1286_v35  ;;  %v1590_v50 = vld [vmem:[#allocation2 + $0x2d4] sm:$0xf] }
  0x43   :  { %734 = vmatpush.bf16.msrb.mxu0 %v1317_v46  ;;  %v1773_v38 = vld [vmem:[#allocation1 + $0x2d] sm:$0xff]  ;;  %v1417_v46 = vor.u32 %v1592_v36, %v1414_v37  ;;  %v1217_v48 = vor.u32 %v1542_v40, %v1214_v41  ;;  %v1278_v49 = vld [vmem:[#allocation2 + $0x1d8] sm:$0xf0]  ;;  %v1538_v3 = vld [vmem:[#allocation2 + $0x134] sm:$0xf] }
  0x44   :  { %785 = vmatpush.bf16.msra.mxu2 %v1137_v42  ;;  %v1574_v42 = vld [vmem:[#allocation2 + $0x254] sm:$0xf]  ;;  %v1406_v51 = vld [vmem:[#allocation2 + $0x2d8] sm:$0xf0]  ;;  %v1540_v53 = vld [vmem:[#allocation2 + $0x144] sm:$0xf] }
  0x45   :  { %773 = vmatpush.bf16.msrb.mxu3 %v1065_v47  ;;  %v1558_v47 = vld [vmem:[#allocation2 + $0x1d4] sm:$0xf]  ;;  %v1345_v52 = vor.u32 %v1574_v42, %v1342_v43  ;;  %v1334_v56 = vld [vmem:[#allocation2 + $0x248] sm:$0xf0]  ;;  %v1409_v58 = vor.u32 %v1590_v50, %v1406_v51  ;;  %v1588_v62 = vld [vmem:[#allocation2 + $0x2c4] sm:$0xf] }
  0x46   :  { %747 = vmatpush.bf16.msrb.mxu1 %v1381_v54  ;;  %v1206_v54 = vld [vmem:[#allocation2 + $0x148] sm:$0xf0]  ;;  %v1281_v57 = vor.u32 %v1558_v47, %v1278_v49  ;;  %v1198_v6 = vld [vmem:[#allocation2 + $0x138] sm:$0xf0]  ;;  %v1554_v9 = vld [vmem:[#allocation2 + $0x1b4] sm:$0xf] }
  0x47   :  { %735 = vmatpush.bf16.msrb.mxu0 %v1309_v59  ;;  %v1556_v59 = vld [vmem:[#allocation2 + $0x1c4] sm:$0xf]  ;;  %v1209_v61 = vor.u32 %v1540_v53, %v1206_v54  ;;  %v1398_v63 = vld [vmem:[#allocation2 + $0x2c8] sm:$0xf0]  ;;  %v1201_v10 = vor.u32 %v1538_v3, %v1198_v6  ;;  %v1586_v12 = vld [vmem:[#allocation2 + $0x2b4] sm:$0xf] }
  0x48   :  { %786 = vmatpush.bf16.msra.mxu2 %v1129_v55  ;;  %v1572_v55 = vld [vmem:[#allocation2 + $0x244] sm:$0xf]  ;;  %v1390_v13 = vld [vmem:[#allocation2 + $0x2b8] sm:$0xf0]  ;;  %v1190_v16 = vld [vmem:[#allocation2 + $0x128] sm:$0xf0] }
  0x49   :  { %774 = vmatpush.bf16.msrb.mxu3 %v1057_v60  ;;  %v1270_v60 = vld [vmem:[#allocation2 + $0x1c8] sm:$0xf0]  ;;  %v1337_v1 = vor.u32 %v1572_v55, %v1334_v56  ;;  %v1568_v17 = vld [vmem:[#allocation2 + $0x224] sm:$0xf]  ;;  %v1182_v28 = vld [vmem:[#allocation2 + $0x118] sm:$0xf0] }
  0x4a   :  { %748 = vmatpush.bf16.msrb.mxu1 %v1373_v7  ;;  %v1570_v7 = vld [vmem:[#allocation2 + $0x234] sm:$0xf]  ;;  %v1273_v8 = vor.u32 %v1556_v59, %v1270_v60  ;;  %v1318_v18 = vld [vmem:[#allocation2 + $0x228] sm:$0xf0]  ;;  %v1552_v21 = vld [vmem:[#allocation2 + $0x1a4] sm:$0xf] }
  0x4b   :  { %736 = vmatpush.bf16.msrb.mxu0 %v1301_v14  ;;  %v1254_v23 = vld [vmem:[#allocation2 + $0x1a8] sm:$0xf0]  ;;  %v1321_v26 = vor.u32 %v1568_v17, %v1318_v18  ;;  %v1566_v29 = vld [vmem:[#allocation2 + $0x214] sm:$0xf]  ;;  %v1246_v36 = vld [vmem:[#allocation2 + $0x198] sm:$0xf0] }
  0x4c   :  { %787 = vmatpush.bf16.msra.mxu2 %v1121_v11  ;;  %v1262_v11 = vld [vmem:[#allocation2 + $0x1b8] sm:$0xf0]  ;;  %v1382_v25 = vld [vmem:[#allocation2 + $0x2a8] sm:$0xf0]  ;;  %v1582_v37 = vld [vmem:[#allocation2 + $0x294] sm:$0xf] }
  0x4d   :  { %775 = vmatpush.bf16.msrb.mxu3 %v1049_v15  ;;  %v1536_v15 = vld [vmem:[#allocation2 + $0x124] sm:$0xf]  ;;  %v1174_v42 = vld [vmem:[#allocation2 + $0x108] sm:$0xf0]  ;;  %v1605_v59 = vld [vmem:[%s1842_s3 + $0x38] sm:$0xff] }
  0x4e   :  { %749 = vmatpush.bf16.msrb.mxu1 %v1365_v24  ;;  %737 = vmatmul.bf16.vlgmr.msrb.gmra.mxu0 %v1771_v30  ;;  %v1193_v22 = vor.u32 %v1536_v15, %v1190_v16  ;;  %v1584_v24 = vld [vmem:[#allocation2 + $0x2a4] sm:$0xf]  ;;  %v1430_v47 = vld [vmem:[#allocation2 + $0x308] sm:$0xf0]  ;;  %v154_v3 = vld [vmem:[#allocation5] sm:$0x3] }
  0x4f   :  { %794 = vmatpush.bf16.msra.mxu0 %v1233_v19  ;;  %v1265_v19 = vor.u32 %v1554_v9, %v1262_v11  ;;  %v1385_v33 = vor.u32 %v1584_v24, %v1382_v25  ;;  %v1532_v41 = vld [vmem:[#allocation2 + $0x104] sm:$0xf]  ;;  %v1366_v55 = vld [vmem:[#allocation2 + $0x288] sm:$0xf0]  ;;  %v1609_v24 = vld [vmem:[%s1842_s3 + $0x58] sm:$0xff] }
  0x50   :  { %788 = vmatpush.bf16.msra.mxu2 %v1113_v27  ;;  %776 = vmatmul.bf16.vlgmr.msrb.gmra.mxu3 %v1757_v2  ;;  %v1401_v2 = vor.u32 %v1588_v62, %v1398_v63  ;;  %v1534_v27 = vld [vmem:[#allocation2 + $0x114] sm:$0xf]  ;;  %v1564_v43 = vld [vmem:[#allocation2 + $0x204] sm:$0xf]  ;;  %v1177_v50 = vor.u32 %v1532_v41, %v1174_v42  ;;  %v1604_v60 = vld [vmem:[%s1842_s3 + $0x30] sm:$0xff] }
  0x51   :  { %820 = vmatpush.bf16.msra.mxu3 %v1361_v20  ;;  %750 = vmatmul.bf16.vlgmr.msrb.gmra.mxu1 %v1773_v38  ;;  %v1393_v20 = vor.u32 %v1586_v12, %v1390_v13  ;;  %v1185_v35 = vor.u32 %v1534_v27, %v1182_v28  ;;  %v1548_v51 = vld [vmem:[#allocation2 + $0x184] sm:$0xf]  ;;  %v1598_v63 = vld [vmem:[%s1842_s3] sm:$0xff]  ;;  %v1608_v28 = vld [vmem:[%s1842_s3 + $0x50] sm:$0xff] }
  0x52   :  { %807 = vmatpush.bf16.msra.mxu1 %v1297_v31  ;;  %v1310_v31 = vld [vmem:[#allocation2 + $0x218] sm:$0xf0]  ;;  %v1580_v54 = vld [vmem:[#allocation2 + $0x284] sm:$0xf] }
  0x53   :  { %795 = vmatpush.bf16.msra.mxu0 %v1225_v34  ;;  %789 = vmatmul.bf16.vlgmr.msra.gmra.mxu2 %v1762_v5  ;;  %v1326_v5 = vld [vmem:[#allocation2 + $0x238] sm:$0xf0]  ;;  %v1550_v34 = vld [vmem:[#allocation2 + $0x194] sm:$0xf]  ;;  %v1313_v40 = vor.u32 %v1566_v29, %v1310_v31  ;;  %v1611_v16 = vld [vmem:[%s1842_s3 + $0x68] sm:$0xff] }
  0x54   :  { %833 = vmatpush.bf16.msrb.mxu2 %v1425_v32  ;;  %v1329_v14 = vor.u32 %v1570_v7, %v1326_v5  ;;  %v1257_v32 = vor.u32 %v1552_v21, %v1254_v23  ;;  %v1613_v5 = vld [vmem:[%s1842_s3 + $0x78] sm:$0xff] }
  0x55   :  { %821 = vmatpush.bf16.msra.mxu3 %v1353_v39  ;;  %v1374_v39 = vld [vmem:[#allocation2 + $0x298] sm:$0xf0] }
  0x56   :  { %808 = vmatpush.bf16.msra.mxu1 %v1289_v44  ;;  %v1302_v44 = vld [vmem:[#allocation2 + $0x208] sm:$0xf0]  ;;  %v1377_v49 = vor.u32 %v1582_v37, %v1374_v39  ;;  %v157_v39 = vperm.slane %v154_v3, 1 }
  0x57   :  { %796 = vmatpush.bf16.msra.mxu0 %v1217_v48  ;;  %v1249_v48 = vor.u32 %v1550_v34, %v1246_v36  ;;  %v1305_v53 = vor.u32 %v1564_v43, %v1302_v44  ;;  %v1607_v34 = vld [vmem:[%s1842_s3 + $0x48] sm:$0xff] }
  0x58   :  { %834 = vmatpush.bf16.msrb.mxu2 %v1417_v46  ;;  %v1596_v46 = vld [vmem:[#allocation2 + $0x304] sm:$0xf] }
  0x59   :  { %822 = vmatpush.bf16.msra.mxu3 %v1345_v52  ;;  %v1238_v52 = vld [vmem:[#allocation2 + $0x188] sm:$0xf0]  ;;  %v1433_v56 = vor.u32 %v1596_v46, %v1430_v47 }
  0x5a   :  { %809 = vmatpush.bf16.msra.mxu1 %v1281_v57  ;;  %v1241_v57 = vor.u32 %v1548_v51, %v1238_v52 }
  0x5b   :  { %797 = vmatpush.bf16.msra.mxu0 %v1209_v61 }
  0x5c   :  { %835 = vmatpush.bf16.msrb.mxu2 %v1409_v58  ;;  %v1369_v58 = vor.u32 %v1580_v54, %v1366_v55 }
  0x5d   :  { %823 = vmatpush.bf16.msra.mxu3 %v1337_v1 }
  0x5e   :  { %810 = vmatpush.bf16.msra.mxu1 %v1273_v8 }
  0x5f   :  { %798 = vmatpush.bf16.msra.mxu0 %v1201_v10  ;;  %v1612_v10 = vld [vmem:[%s1842_s3 + $0x70] sm:$0xff] }
  0x60   :  { %836 = vmatpush.bf16.msrb.mxu2 %v1401_v2  ;;  %v156_v2 = vperm.slane %v154_v3, 0 }
  0x61   :  { %824 = vmatpush.bf16.msra.mxu3 %v1329_v14 }
  0x62   :  { %811 = vmatpush.bf16.msra.mxu1 %v1265_v19  ;;  %v1610_v19 = vld [vmem:[%s1842_s3 + $0x60] sm:$0xff] }
  0x63   :  { %799 = vmatpush.bf16.msra.mxu0 %v1193_v22 }
  0x64   :  { %837 = vmatpush.bf16.msrb.mxu2 %v1393_v20 }
  0x65   :  { %825 = vmatpush.bf16.msra.mxu3 %v1321_v26 }
  0x66   :  { %812 = vmatpush.bf16.msra.mxu1 %v1257_v32 }
  0x67   :  { %800 = vmatpush.bf16.msra.mxu0 %v1185_v35  ;;  %v1606_v35 = vld [vmem:[%s1842_s3 + $0x40] sm:$0xff] }
  0x68   :  { %838 = vmatpush.bf16.msrb.mxu2 %v1385_v33 }
  0x69   :  { %826 = vmatpush.bf16.msra.mxu3 %v1313_v40 }
  0x6a   :  { %813 = vmatpush.bf16.msra.mxu1 %v1249_v48 }
  0x6b   :  { %801 = vmatpush.bf16.msra.mxu0 %v1177_v50 }
  0x6c   :  { %839 = vmatpush.bf16.msrb.mxu2 %v1377_v49 }
  0x6d   :  { %827 = vmatpush.bf16.msra.mxu3 %v1305_v53 }
  0x6e   :  { %814 = vmatpush.bf16.msra.mxu1 %v1241_v57  ;;  %802 = vmatmul.bf16.vlgmr.msra.gmra.mxu0 %v1755_v0  ;;  %v1603_v0 = vld [vmem:[%s1842_s3 + $0x28] sm:$0xff] }
  0x6f   :  { %853 = vmatpush.bf16.msrb.mxu0 %v1433_v56 }
  0x70   :  { %828 = vmatmul.bf16.vlgmr.msra.gmra.mxu3 %v1771_v30  ;;  %840 = vmatpush.bf16.msrb.mxu2 %v1369_v58  ;;  %v1600_v30 = vld [vmem:[%s1842_s3 + $0x10] sm:$0xff] }
  0x71   :  { %815 = vmatmul.bf16.vlgmr.msra.gmra.mxu1 %v1760_v4  ;;  %v1602_v4 = vld [vmem:[%s1842_s3 + $0x20] sm:$0xff]  ;;  %1008 = vmatpush.bf16.msrb.mxu3 %v1613_v5 }
  0x72   :  { %995 = vmatpush.bf16.msrb.mxu1 %v1605_v59 }
  0x73   :  { %841 = vmatmul.bf16.vlgmr.msrb.gmra.mxu2 %v1773_v38  ;;  %v1599_v38 = vld [vmem:[%s1842_s3 + $0x8] sm:$0xff] }
  0x75   :  { %1009 = vmatpush.bf16.msrb.mxu3 %v1612_v10 }
  0x76   :  { %996 = vmatpush.bf16.msrb.mxu1 %v1604_v60 }
  0x79   :  { %1010 = vmatpush.bf16.msrb.mxu3 %v1611_v16 }
  0x7a   :  { %997 = vmatpush.bf16.msrb.mxu1 %v1603_v0 }
  0x7d   :  { %1011 = vmatpush.bf16.msrb.mxu3 %v1610_v19 }
  0x7e   :  { %1435 = vmatmul.msk.bf16.vlgmr.msrb.gmra.mxu0 %vm674_vm0, %v1767_v45  ;;  %998 = vmatpush.bf16.msrb.mxu1 %v1602_v4  ;;  %v1601_v45 = vld [vmem:[%s1842_s3 + $0x18] sm:$0xff]  ;;  %v1621_v4 = vld [vmem:[%s1843_s4] ss:$0 sm:$0xff] }
  0x81   :  { %1012 = vmatpush.bf16.msrb.mxu3 %v1609_v24 }
  0x82   :  { %999 = vmatpush.bf16.msrb.mxu1 %v1601_v45 }
  0x85   :  { %1013 = vmatpush.bf16.msrb.mxu3 %v1608_v28 }
  0x86   :  { %1000 = vmatpush.bf16.msrb.mxu1 %v1600_v30 }
  0x89   :  { %1014 = vmatpush.bf16.msrb.mxu3 %v1607_v34 }
  0x8a   :  { %1001 = vmatpush.bf16.msrb.mxu1 %v1599_v38 }
  0x8d   :  { %1015 = vmatpush.bf16.msrb.mxu3 %v1606_v35 }
  0x8e   :  { %1002 = vmatpush.bf16.msrb.mxu1 %v1598_v63 }
  0xab   :  { %v686_v61 = vpop.f32.mrf.mxu0 }
  0xac   :  { %v687_v11 = vadd.f32 %v686_v61, %v156_v2 }
  0xae   :  { %v699_v62 = vpop.f32.mrf.mxu1 }
  0xaf   :  { %v700_v13 = vadd.f32 %v699_v62, %v687_v11 }
  0xb2   :  { %v712_v1 = vpop.f32.mrf.mxu2 }
  0xb3   :  { %v725_v6 = vpop.f32.mrf.mxu3  ;;  %v688_v7 = vpop.f32.mrf.mxu0  ;;  %v713_v15 = vadd.f32 %v712_v1, %v700_v13 }
  0xb5   :  { %v726_v17 = vadd.f32 %v725_v6, %v713_v15 }
  0xb6   :  { %v701_v8 = vpop.f32.mrf.mxu1 }
  0xba   :  { %v714_v9 = vpop.f32.mrf.mxu2 }
  0xbb   :  { %v727_v12 = vpop.f32.mrf.mxu3 }
  0xc2   :  { %v764_v14 = vpop.f32.mrf.mxu2 }
  0xca   :  { %v766_v21 = vpop.f32.mrf.mxu2 }
  0xcb   :  { %v738_v18 = vpop.f32.mrf.mxu0 }
  0xcc   :  { %v739_v20 = vadd.f32 %v738_v18, %v726_v17 }
  0xce   :  { %v751_v22 = vpop.f32.mrf.mxu1 }
  0xcf   :  { %v752_v23 = vadd.f32 %v751_v22, %v739_v20 }
  0xd1   :  { %v765_v25 = vadd.f32 %v764_v14, %v752_v23 }
  0xd3   :  { %v859_v26 = vmax.f32 %v765_v25, 0.0  ;;  %v740_v27 = vpop.f32.mrf.mxu0  ;;  %v777_v32 = vpop.f32.mrf.mxu3 }
  0xd4   :  { %v778_v40 = vadd.f32 %v777_v32, %v157_v39 }
  0xd5   :  { %v861_v29 = vpack.c.bf16 %v859_v26, %v859_v26 }
  0xd6   :  { %v790_v31 = vpop.f32.mrf.mxu2  ;;  %v753_v33 = vpop.f32.mrf.mxu1 }
  0xd7   :  { %1003 = vmatmul.bf16.vlgmr.msrb.gmra.mxu1 %v861_v29  ;;  %v791_v42 = vadd.f32 %v790_v31, %v778_v40 }
  0xdb   :  { %v779_v37 = vpop.f32.mrf.mxu3 }
  0xde   :  { %v792_v36 = vpop.f32.mrf.mxu2 }
  0xeb   :  { %v803_v41 = vpop.f32.mrf.mxu0 }
  0xec   :  { %v804_v44 = vadd.f32 %v803_v41, %v791_v42 }
  0xee   :  { %v816_v43 = vpop.f32.mrf.mxu1 }
  0xef   :  { %v817_v48 = vadd.f32 %v816_v43, %v804_v44 }
  0xf3   :  { %v829_v46 = vpop.f32.mrf.mxu3  ;;  %v805_v47 = vpop.f32.mrf.mxu0 }
  0xf4   :  { %v830_v50 = vadd.f32 %v829_v46, %v817_v48 }
  0xf6   :  { %v842_v49 = vpop.f32.mrf.mxu2  ;;  %v818_v51 = vpop.f32.mrf.mxu1 }
  0xf7   :  { %v843_v52 = vadd.f32 %v842_v49, %v830_v50 }
  0xfb   :  { %v831_v53 = vpop.f32.mrf.mxu3  ;;  %v855_v54 = vpop.f32.mrf.mxu0 }
  0xfc   :  { %v856_v55 = vadd.f32 %v855_v54, %v843_v52 }
  0xfe   :  { %v844_v56 = vpop.f32.mrf.mxu2  ;;  %v860_v57 = vmax.f32 %v856_v55, 0.0 }
 0x100   :  { %v862_v58 = vpack.c.bf16 %v860_v57, %v860_v57 }
 0x102   :  { %1016 = vmatmul.bf16.vlgmr.msrb.gmra.mxu3 %v862_v58 }
 0x103   :  { %v857_v59 = vpop.f32.mrf.mxu0 }
 0x154   :  { %v1004_v60 = vpop.f32.mrf.mxu1 }
 0x155   :  { %v1005_v45 = vadd.f32 %v1621_v4, %v1004_v60 }
 0x15c   :  { %v1006_v0 = vpop.f32.mrf.mxu1 }
 0x185   :  { %v1017_v30 = vpop.f32.mrf.mxu3 }
 0x186   :  { %v1018_v38 = vadd.f32 %v1017_v30, %v1005_v45 }
 0x188   :  { %1021 = vst [vmem:[#allocation7] sm:$0xff] %v1018_v38 }
 0x18d   :  { %v1019_v61 = vpop.f32.mrf.mxu3 }
 0x18e   :  { %1025 = vsyncadd [#allocation4], 96  ;;  %s1028_s17 = sshll.u32 %s1844_s5, 4  ;;  %s1704_s18 = smov [#allocation7]   ;;  %s1029_s17 = int_to_ptr.hbm [resolvable:$true] %s1028_s17 }
 0x18f   :  { %s1026_s19 = sshll.u32 %s1704_s18, 4  ;;  %s1705_s20 = smov 32   ;;  %s1027_s19 = int_to_ptr.vmem [resolvable:$true] %s1026_s19 }
 0x190   :  { %s1706_s21 = smov 2  }
 0x191   :  { %1034 = dma.vmem_to_hbm [thread:$0]  %s1027_s19, 32, %s1029_s17, [#allocation4], %s1705_s20, %s1705_s20, %s1706_s21  }
 0x192   :  { %1698 = dma.done.wait [#allocation4], 128  }
 0x193   :  { %1699 = vsyncadd [#allocation4], 4294967168 }
 0x194   :  { %1039 = vsyncpa [#allocation3], 1 }
 0x195   :  { %1040 = vsyncpa [#allocation6], 1 }
 0x196   :  { %1041 = vsyncpa [#allocation4], 1 }

</bundles_post_ra>
